<compile_context>
chip_gen: v5e
topology: v5e:2x2
jax: 0.10.0
libtpu: 0.0.40
codegen_flags: <defaults>
</compile_context>

<pallas_src>
import jax
import jax.numpy as jnp
from jax import lax
from jax.experimental import pallas as pl
from jax.experimental.pallas import tpu as pltpu


def _round_up(x, m):
    return ((x + m - 1) // m) * m


# ----------------------------------------------------------------------------
# Kernel 1: tiled matmul + bias (used for both projections).
# ----------------------------------------------------------------------------
def matmul_bias_kernel(x_ref, w_ref, b_ref, o_ref):
    o_ref[...] = (
        jnp.dot(x_ref[...], w_ref[...], preferred_element_type=jnp.float32)
        + b_ref[...]
    ).astype(o_ref.dtype)


def matmul_bias(x, w, b, *, max_tm=256, max_tn=512):
    """y = x @ w + b with x:(M,K), w:(K,N), b:(1,N) -> (M,N) float32.

    Tiles are always bounded (256 x 512 keeps 2x(tm*K + K*tn + tm*tn) operands well
    under the 32 MiB scoped-VMEM default on every generation for this model's K);
    edge cases are handled by zero-padding M/N to a tile multiple and slicing the
    result (zero rows/cols are exact since the bias is added after the dot).
    K stays untiled (it is E or H, small for this model).
    """
    M, K = x.shape
    K2, N = w.shape
    assert K == K2
    tm = max_tm if M >= max_tm else _round_up(M, 8)
    tn = max_tn if N >= max_tn else _round_up(N, 128)
    Mp, Np = _round_up(M, tm), _round_up(N, tn)
    if Mp != M:
        x = jnp.pad(x, ((0, Mp - M), (0, 0)))
    if Np != N:
        w = jnp.pad(w, ((0, 0), (0, Np - N)))
        b = jnp.pad(b, ((0, 0), (0, Np - N)))

    # Grid order (N_blocks, M_blocks): M (i) is the fast axis, so the weight tile
    # (indexed only by the slow axis j) is DMA'd from HBM once per j -> W streamed once.
    grid = (Np // tn, Mp // tm)
    out = pl.pallas_call(
        matmul_bias_kernel,
        out_shape=jax.ShapeDtypeStruct((Mp, Np), jnp.float32),
        grid=grid,
        in_specs=[
            pl.BlockSpec((tm, K), lambda j, i: (i, 0)),
            pl.BlockSpec((K, tn), lambda j, i: (0, j)),
            pl.BlockSpec((1, tn), lambda j, i: (0, j)),
        ],
        out_specs=pl.BlockSpec((tm, tn), lambda j, i: (i, j)),
        compiler_params=pltpu.CompilerParams(
            dimension_semantics=("parallel", "parallel")),
    )(x, w, b)
    if Mp != M or Np != N:
        out = out[:M, :N]
    return out


# ----------------------------------------------------------------------------
# Kernel 2: the serial recurrence.  Grid = (batch_blocks, T_chunks); the hidden
# state lives in a VMEM scratch accumulator (persists across T chunks, reset under
# pl.when(t==0) for each batch block).  W_hh is indexed (0,0) for every grid point
# so it is fetched once.  Inside a chunk, h is carried as a fori_loop VALUE and the
# loop is unrolled so the MXU push/pop of step t overlaps tanh/store of step t-1.
# Recurrence math stays f32 (serial error accumulation; H x H is tiny anyway).
# ----------------------------------------------------------------------------
def rnn_recurrence_kernel(u_ref, whh_ref, hs_ref, h_ref):
    t_idx = pl.program_id(1)

    @pl.when(t_idx == 0)
    def _():
        h_ref[...] = jnp.zeros_like(h_ref)

    t_chunk = u_ref.shape[0]
    whh = whh_ref[...]                       # hoisted: loaded once per chunk

    def step(i, h_prev):
        pre = u_ref[i] + jnp.dot(h_prev, whh,
                                 preferred_element_type=jnp.float32)
        h_t = jnp.tanh(pre)
        hs_ref[i] = h_t
        return h_t

    unroll = True if t_chunk <= 16 else 8
    h_final = lax.fori_loop(0, t_chunk, step, h_ref[...], unroll=unroll)
    h_ref[...] = h_final                     # carry state to the next T chunk


def rnn_recurrence(u_tm, whh_t, *, max_t_chunk=32):
    """u_tm: (T, B, H) f32 (input projection + biases), whh_t: (H, H) f32 -> hs (T,B,H)."""
    T, B, H = u_tm.shape

    # Shard the (fully batch-independent) recurrence across TensorCores when the
    # half-batch keeps sublane alignment; otherwise keep one batch block.
    b_blk = B // 2 if (B % 2 == 0 and (B // 2) % 8 == 0) else B
    nb = B // b_blk

    # Largest divisor of T <= max_t_chunk: bounds VMEM (U chunk + hs chunk double-
    # buffered) and lets the U DMA-in / hs writeback pipeline behind the serial compute.
    t_chunk = 1
    for c in range(1, min(T, max_t_chunk) + 1):
        if T % c == 0:
            t_chunk = c
    nt = T // t_chunk

    return pl.pallas_call(
        rnn_recurrence_kernel,
        out_shape=jax.ShapeDtypeStruct((T, B, H), jnp.float32),
        grid=(nb, nt),                       # T is the fast axis: all chunks of one
        in_specs=[                           # batch block run before the next block.
            pl.BlockSpec((t_chunk, b_blk, H), lambda b, t: (t, b, 0)),
            pl.BlockSpec((H, H), lambda b, t: (0, 0)),
        ],
        out_specs=pl.BlockSpec((t_chunk, b_blk, H), lambda b, t: (t, b, 0)),
        scratch_shapes=[pltpu.VMEM((b_blk, H), jnp.float32)],
        compiler_params=pltpu.CompilerParams(
            dimension_semantics=("parallel", "arbitrary")),
    )(u_tm, whh_t)


# ----------------------------------------------------------------------------
# Forward pass matching the PyTorch module.
# ----------------------------------------------------------------------------
def lm_rnn_forward(token_ids, params):
    """token_ids: (B, T) int32.  Returns logits (B, V, T) like the PyTorch module."""
    emb_table = params["emb_table"]                   # (V, E), pad row zeroed
    wih_t = params["w_ih_t"]                          # (E, H) bf16, pre-transposed
    whh_t = params["w_hh_t"]                          # (H, H) f32, pre-transposed
    wout_t = params["w_out_t"]                        # (H, V) bf16, pre-transposed
    b_rnn = params["b_rnn"]                           # (1, H) = b_ih + b_hh (pre-folded)
    b_out = params["b_out"].reshape(1, -1)            # (1, V)

    B, T = token_ids.shape
    V, E = emb_table.shape
    H = wih_t.shape[1]

    # Embedding gather directly in time-major order (no gather + transpose pass).
    ids_tm = jnp.transpose(token_ids).reshape(T * B)
    emb_flat = jnp.take(emb_table, ids_tm, axis=0)                    # (T*B, E)

    # Phase 1: input projection, one large parallel matmul (bf16 operands, f32 acc).
    u = matmul_bias(emb_flat.astype(jnp.bfloat16), wih_t, b_rnn)      # (T*B, H) f32
    u_tm = u.reshape(T, B, H)

    # Phase 2: the only truly serial part of the model.
    hs = rnn_recurrence(u_tm, whh_t)                                  # (T, B, H) f32

    # Phase 3: output projection (W_out streamed once; lane-dense V stores).
    logits = matmul_bias(hs.reshape(T * B, H).astype(jnp.bfloat16),
                         wout_t, b_out)                               # (T*B, V) f32

    # PyTorch: self.output(rnn_out).permute(0, 2, 1) -> (B, V, T)
    # TODO(synk): fuse this permute into Phase 3 (rectangular (B, tn, tm/B) stores)
    # only when T >= 128; below that the fused store is lane-sparse and slower.
    return jnp.transpose(logits.reshape(T, B, V), (1, 2, 0))


# ----------------------------------------------------------------------------
# Pure-JAX f32 reference matching the PyTorch forward semantics.
# ----------------------------------------------------------------------------
def lm_rnn_reference(token_ids, params):
    emb = jnp.take(params["emb_table"], token_ids, axis=0)            # (B, T, E)
    B = token_ids.shape[0]
    H = params["w_hh"].shape[0]

    def step(h, x):
        h_new = jnp.tanh(x @ params["w_ih"].T + params["b_ih"]
                         + h @ params["w_hh"].T + params["b_hh"])
        return h_new, h_new

    h0 = jnp.zeros((B, H), jnp.float32)
    _, hs = lax.scan(step, h0, jnp.transpose(emb, (1, 0, 2)))         # (T, B, H)
    hs = jnp.transpose(hs, (1, 0, 2))                                 # (B, T, H)
    out = hs @ params["w_out"].T + params["b_out"]                    # (B, T, V)
    return jnp.transpose(out, (0, 2, 1))                              # (B, V, T)


def init_params(key, emb_size, hidden_size, output_size, pad_index=0):
    k_emb, k_wih, k_whh, k_bih, k_bhh, k_wout, k_bout = jax.random.split(key, 7)
    scale = 1.0 / jnp.sqrt(hidden_size)

    emb_table = jax.random.normal(k_emb, (output_size, emb_size), jnp.float32)
    emb_table = emb_table.at[pad_index].set(0.0)   # padding_idx row is zero

    params = {
        "emb_table": emb_table,
        "w_ih": jax.random.uniform(k_wih, (hidden_size, emb_size), jnp.float32, -scale, scale),
        "w_hh": jax.random.uniform(k_whh, (hidden_size, hidden_size), jnp.float32, -scale, scale),
        "b_ih": jax.random.uniform(k_bih, (hidden_size,), jnp.float32, -scale, scale),
        "b_hh": jax.random.uniform(k_bhh, (hidden_size,), jnp.float32, -scale, scale),
        "w_out": jax.random.uniform(k_wout, (output_size, hidden_size), jnp.float32, -scale, scale),
        "b_out": jax.random.uniform(k_bout, (output_size,), jnp.float32, -scale, scale),
    }
    # Pre-transposed / pre-cast / pre-folded copies used by the kernel path (done once,
    # not per forward call): avoids an XLA transpose + cast pass over W_out each step.
    params["w_ih_t"] = jnp.transpose(params["w_ih"]).astype(jnp.bfloat16)    # (E, H)
    params["w_hh_t"] = jnp.transpose(params["w_hh"])                         # (H, H) f32
    params["w_out_t"] = jnp.transpose(params["w_out"]).astype(jnp.bfloat16)  # (H, V)
    params["b_rnn"] = (params["b_ih"] + params["b_hh"]).reshape(1, hidden_size)
    return params


if __name__ == "__main__":
    B, T = 2, 8
    emb_size, hidden_size, output_size = 32, 32, 64
    pad_index = 0

    key = jax.random.PRNGKey(0)
    k_params, k_ids = jax.random.split(key)
    params = init_params(k_params, emb_size, hidden_size, output_size, pad_index)

    token_ids = jax.random.randint(k_ids, (B, T), 0, output_size, dtype=jnp.int32)
    token_ids = token_ids.at[:, -1].set(pad_index)   # include some pad tokens

    out = lm_rnn_forward(token_ids, params)
    out = jax.block_until_ready(out)

    ref = lm_rnn_reference(token_ids, params)
    assert out.shape == (B, output_size, T), out.shape
    err = float(jnp.max(jnp.abs(out - ref)))
    # bf16 matmul operands (f32 accumulation) -> looser tolerance than the f32 path.
    assert jnp.allclose(out, ref, atol=5e-2, rtol=5e-2), err

    print("KERNEL_OK")
</pallas_src>

<mosaic_0001>
module attributes {stable_mosaic.version = 11 : i64} {
  func.func @matmul_bias_kernel(%arg0: i32, %arg1: i32, %arg2: memref<16x32xbf16, #tpu.memory_space<vmem>>, %arg3: memref<32x128xbf16, #tpu.memory_space<vmem>>, %arg4: memref<1x128xf32, #tpu.memory_space<vmem>>, %arg5: memref<16x128xf32, #tpu.memory_space<vmem>>) attributes {dimension_semantics = [#tpu.dimension_semantics<parallel>, #tpu.dimension_semantics<parallel>], iteration_bounds = array<i64: 1, 1>, scalar_prefetch = 0 : i64, scratch_operands = 0 : i64, tpu.core_type = #tpu.core_type<tc>, window_params = [{transform_indices = @transform_0, window_bounds = array<i64: 16, 32>}, {transform_indices = @transform_1, window_bounds = array<i64: 32, 128>}, {transform_indices = @transform_2, window_bounds = array<i64: 1, 128>}, {transform_indices = @transform_3, window_bounds = array<i64: 16, 128>}]} {
    %c0 = arith.constant 0 : index
    %c0_0 = arith.constant 0 : index
    %0 = vector.load %arg2[%c0, %c0_0] : memref<16x32xbf16, #tpu.memory_space<vmem>>, vector<16x32xbf16>
    %c0_1 = arith.constant 0 : index
    %c0_2 = arith.constant 0 : index
    %1 = vector.load %arg3[%c0_1, %c0_2] : memref<32x128xbf16, #tpu.memory_space<vmem>>, vector<32x128xbf16>
    %cst = arith.constant dense<0.000000e+00> : vector<16x128xf32>
    %2 = tpu.matmul %0, %1, %cst {dimension_numbers = #tpu.dot_dimension_numbers<[1], [0], [0], [1], [0, 0, 1, 1], [], []>} : vector<16x32xbf16>, vector<32x128xbf16>, vector<16x128xf32> -> vector<16x128xf32>
    %c0_3 = arith.constant 0 : index
    %c0_4 = arith.constant 0 : index
    %3 = vector.load %arg4[%c0_3, %c0_4] : memref<1x128xf32, #tpu.memory_space<vmem>>, vector<1x128xf32>
    %4 = vector.broadcast %3 : vector<1x128xf32> to vector<16x128xf32>
    %5 = arith.addf %2, %4 : vector<16x128xf32>
    %c0_5 = arith.constant 0 : index
    %c0_6 = arith.constant 0 : index
    %6 = vector.load %arg5[%c0_5, %c0_6] : memref<16x128xf32, #tpu.memory_space<vmem>>, vector<16x128xf32>
    tpu.vector_store %arg5[%c0_5, %c0_6], %5 {strides = array<i32>} : memref<16x128xf32, #tpu.memory_space<vmem>>, vector<16x128xf32>,
    return
  }
  func.func @transform_0(%arg0: i32, %arg1: i32) -> (i32, i32) {
    %c0_i32 = arith.constant 0 : i32
    %c0_i32_0 = arith.constant 0 : i32
    return %arg1, %c0_i32 : i32, i32
  }
  func.func @transform_1(%arg0: i32, %arg1: i32) -> (i32, i32) {
    %c0_i32 = arith.constant 0 : i32
    %c0_i32_0 = arith.constant 0 : i32
    return %c0_i32, %arg0 : i32, i32
  }
  func.func @transform_2(%arg0: i32, %arg1: i32) -> (i32, i32) {
    %c0_i32 = arith.constant 0 : i32
    %c0_i32_0 = arith.constant 0 : i32
    return %c0_i32, %arg0 : i32, i32
  }
  func.func @transform_3(%arg0: i32, %arg1: i32) -> (i32, i32) {
    %c0_i32 = arith.constant 0 : i32
    return %arg1, %arg0 : i32, i32
  }
}

</mosaic_0001>

<bundles_post_ra>
// kernel: tpu_custom_call.1
= control target key start
LH: loop header
LB: loop body
LE: loop exit
PB: predicated region body
PF: predicated region fallthrough
CT: control target
= control target key end

     0   :  { %8 = vsyncpa [#allocation3], 0  ;;  %s256_s0 = inlined_call_operand.hbm [shape: bf16[16,32], index: 0, kind: input, shape index: {}]   ;;  %s257_s1 = inlined_call_operand.hbm [shape: bf16[32,128], index: 1, kind: input, shape index: {}]   ;;  %s258_s2 = inlined_call_operand.vmem [shape: f32[1,128], index: 2, kind: input, shape index: {}]   ;;  %s259_s3 = inlined_call_operand.hbm [shape: f32[16,128], index: 3, kind: output, shape index: {}]  }
   0x1   :  { %9 = vsyncpa [#allocation6], 0 }
   0x2   :  { %10 = vsyncpa [#allocation4], 0  ;;  %s15_s14 = sshll.u32 %s256_s0, 4  ;;  %s217_s15 = smov [#allocation2]   ;;  %s16_s14 = int_to_ptr.hbm [resolvable:$true] %s15_s14 }
   0x3   :  { %s17_s16 = sshll.u32 %s217_s15, 4  ;;  %s28_s19 = sshll.u32 %s257_s1, 4  ;;  %s18_s16 = int_to_ptr.vmem [resolvable:$true] %s17_s16  ;;  %s29_s19 = int_to_ptr.hbm [resolvable:$true] %s28_s19 }
   0x4   :  { %s218_s20 = smov 64   ;;  %s219_s21 = smov 4  }
   0x5   :  { %23 = dma.hbm_to_vmem [thread:$0]  %s16_s14, 128, %s18_s16, [#allocation3], %s218_s20, %s218_s20, %s219_s21  }
   0x6   :  { %s220_s22 = smov [#allocation5]  }
   0x7   :  { %s30_s23 = sshll.u32 %s220_s22, 4  ;;  %s31_s23 = int_to_ptr.vmem [resolvable:$true] %s30_s23 }
   0x8   :  { %36 = dma.hbm_to_vmem [thread:$0]  %s29_s19, 256, %s31_s23, [#allocation6], %s218_s20, %s218_s20, %s219_s21  }
   0x9   :  { %211 = dma.done.wait [#allocation3], 128  }
   0xa   :  { %212 = vsyncadd [#allocation3], 4294967168 }
   0xb   :  { %213 = dma.done.wait [#allocation6], 256  }
   0xc   :  { %214 = vsyncadd [#allocation6], 4294967040  ;;  %v130_v0 = vld [vmem:[#allocation5 + $0x8] sm:$0xff]  ;;  %v129_v1 = vld [vmem:[#allocation5] sm:$0xff]  ;;  %vm75_vm0 = vcmask 261120   ;;  %s221_s24 = smov [#allocation7]  }
   0xd   :  { %85 = vmatpush.bf16.msra.mxu0 %v130_v0  ;;  %v128_v2 = vld [vmem:[#allocation2] sm:$0xff]  ;;  %s99_s25 = sshll.u32 %s221_s24, 4  ;;  %s101_s28 = sshll.u32 %s259_s3, 4  ;;  %s100_s25 = int_to_ptr.vmem [resolvable:$true] %s99_s25  ;;  %s102_s28 = int_to_ptr.hbm [resolvable:$true] %s101_s28 }
   0xe   :  { %v138_v3 = vld [vmem:[%s258_s2] ss:$0 sm:$0xff]  ;;  %s222_s29 = smov 128   ;;  %s223_s30 = smov 8  }
  0x11   :  { %86 = vmatpush.bf16.msra.mxu0 %v129_v1 }
  0x14   :  { %127 = vmatmul.msk.bf16.vlgmr.msra.gmra.mxu0 %vm75_vm0, %v128_v2 }
  0x91   :  { %v88_v4 = vpop.f32.mrf.mxu0 }
  0x92   :  { %v89_v5 = vadd.f32 %v138_v3, %v88_v4 }
  0x94   :  { %93 = vst [vmem:[#allocation7] sm:$0xff] %v89_v5 }
  0x99   :  { %v90_v6 = vpop.f32.mrf.mxu0 }
  0x9a   :  { %v91_v7 = vadd.f32 %v138_v3, %v90_v6 }
  0x9c   :  { %94 = vst [vmem:[#allocation7 + $0x8] sm:$0xff] %v91_v7 }
  0x9d   :  { %107 = dma.vmem_to_hbm [thread:$0]  %s100_s25, 256, %s102_s28, [#allocation4], %s222_s29, %s222_s29, %s223_s30  }
  0x9e   :  { %215 = dma.done.wait [#allocation4], 256  }
  0x9f   :  { %216 = vsyncadd [#allocation4], 4294967040 }
  0xa0   :  { %112 = vsyncpa [#allocation3], 1 }
  0xa1   :  { %113 = vsyncpa [#allocation6], 1 }
  0xa2   :  { %114 = vsyncpa [#allocation4], 1 }

</bundles_post_ra>
